<compile_context>
chip_gen: v7x
topology: tpu7x:2x2x1
jax: 0.10.0
libtpu: 0.0.40
codegen_flags: <defaults>
</compile_context>

<pallas_src>
import jax
import jax.numpy as jnp
from jax.experimental import pallas as pl
from jax.experimental.pallas import tpu as pltpu


def _round_up(x, m):
    return ((x + m - 1) // m) * m


def _cdiv(a, b):
    return (a + b - 1) // b


def _policy_kernel(x_ref, w1_ref, w2_ref, w3_ref, b1_ref, b2_ref, b3_ref, o_ref):
    # x_ref : (TILE_B, n_inputs)  f32 activations at natural width
    # wN_ref: (in, out)           pre-transposed weights (bf16 or f32), resident
    # bN_ref: (1, out)            f32 biases, resident
    # o_ref : (TILE_B, n_outputs) f32 output, only real columns written
    x = x_ref[...]

    w1 = w1_ref[...]
    w2 = w2_ref[...]
    w3 = w3_ref[...]

    # fc1: MXU matmul (operands in weight dtype, f32 accumulation), f32 bias+tanh.
    h = jnp.dot(x.astype(w1.dtype), w1, preferred_element_type=jnp.float32)
    h = jnp.tanh(h + b1_ref[...])
    # fc2
    h = jnp.dot(h.astype(w2.dtype), w2, preferred_element_type=jnp.float32)
    h = jnp.tanh(h + b2_ref[...])
    # fc3 (no activation); store only the real output columns.
    out = jnp.dot(h.astype(w3.dtype), w3, preferred_element_type=jnp.float32)
    o_ref[...] = (out + b3_ref[...]).astype(o_ref.dtype)


def prepare_policy_params(params, matmul_dtype=jnp.bfloat16):
    """One-time prep: transpose nn.Linear weights to (in, out) and cast matmul
    operands (default bf16 for native MXU throughput on v5e/v6e/v7x).  Biases
    stay f32 (bias-add / tanh run in f32).  No feature-dim padding."""
    return {
        "w1t": jnp.asarray(params["w1"]).T.astype(matmul_dtype),   # (n_in,  n_hid)
        "w2t": jnp.asarray(params["w2"]).T.astype(matmul_dtype),   # (n_hid, n_hid)
        "w3t": jnp.asarray(params["w3"]).T.astype(matmul_dtype),   # (n_hid, n_out)
        "b1": jnp.asarray(params["b1"]).astype(jnp.float32).reshape(1, -1),
        "b2": jnp.asarray(params["b2"]).astype(jnp.float32).reshape(1, -1),
        "b3": jnp.asarray(params["b3"]).astype(jnp.float32).reshape(1, -1),
    }


@jax.jit
def _policy_forward_impl(obs, w1t, w2t, w3t, b1, b2, b3):
    obs = obs.astype(jnp.float32)
    B, n_inputs = obs.shape
    n_hidden = w1t.shape[1]
    n_outputs = w3t.shape[1]

    # Batch tiling: big tiles to amortize per-grid-step overhead, but keep >= 2
    # steps whenever possible so the "parallel" axis shards across both
    # TensorCores on v7x.  Ragged final tile is fine: rows are independent,
    # OOB input rows are garbage but their OOB output rows are never written.
    if B <= 8:
        tile_b = _round_up(max(B, 1), 8)
    else:
        tile_b = min(4096, _round_up(_cdiv(B, 2), 8))
    grid = (_cdiv(B, tile_b),)

    return pl.pallas_call(
        _policy_kernel,
        out_shape=jax.ShapeDtypeStruct((B, n_outputs), jnp.float32),
        grid_spec=pltpu.PrefetchScalarGridSpec(
            num_scalar_prefetch=0,
            grid=grid,
            in_specs=[
                # obs tile at natural width (last dim == full array dim -> legal)
                pl.BlockSpec((tile_b, n_inputs), lambda i: (i, 0)),
                # weights / biases: constant index_map -> resident in VMEM
                pl.BlockSpec((n_inputs, n_hidden), lambda i: (0, 0)),
                pl.BlockSpec((n_hidden, n_hidden), lambda i: (0, 0)),
                pl.BlockSpec((n_hidden, n_outputs), lambda i: (0, 0)),
                pl.BlockSpec((1, n_hidden), lambda i: (0, 0)),
                pl.BlockSpec((1, n_hidden), lambda i: (0, 0)),
                pl.BlockSpec((1, n_outputs), lambda i: (0, 0)),
            ],
            out_specs=pl.BlockSpec((tile_b, n_outputs), lambda i: (i, 0)),
        ),
        compiler_params=pltpu.CompilerParams(
            dimension_semantics=("parallel",),
        ),
    )(obs, w1t, w2t, w3t, b1, b2, b3)


def policy_forward(obs, prepped):
    """Forward pass. `prepped` comes from prepare_policy_params (call once)."""
    return _policy_forward_impl(
        obs,
        prepped["w1t"], prepped["w2t"], prepped["w3t"],
        prepped["b1"], prepped["b2"], prepped["b3"],
    )


def init_policy_params(key, n_inputs, n_hidden, n_outputs):
    """Deterministic init mimicking nn.Linear shapes (out, in) + (out,)."""
    ks = jax.random.split(key, 6)

    def linear_init(kw, kb, fan_in, fan_out):
        bound = 1.0 / jnp.sqrt(fan_in)
        w = jax.random.uniform(kw, (fan_out, fan_in), jnp.float32, -bound, bound)
        b = jax.random.uniform(kb, (fan_out,), jnp.float32, -bound, bound)
        return w, b

    w1, b1 = linear_init(ks[0], ks[1], n_inputs, n_hidden)
    w2, b2 = linear_init(ks[2], ks[3], n_hidden, n_hidden)
    w3, b3 = linear_init(ks[4], ks[5], n_hidden, n_outputs)
    return {"w1": w1, "b1": b1, "w2": w2, "b2": b2, "w3": w3, "b3": b3}


def policy_forward_ref(obs, params):
    """Pure-JAX reference matching the PyTorch forward exactly."""
    x = jnp.tanh(obs @ params["w1"].T + params["b1"])
    x = jnp.tanh(x @ params["w2"].T + params["b2"])
    return x @ params["w3"].T + params["b3"]


if __name__ == "__main__":
    # Small shapes consistent with Policy(n_inputs, n_hidden, n_outputs, lr)
    B, n_inputs, n_hidden, n_outputs = 8, 16, 32, 4

    key = jax.random.PRNGKey(0)
    k_obs, k_params = jax.random.split(key)
    obs = jax.random.normal(k_obs, (B, n_inputs), dtype=jnp.float32)
    params = init_policy_params(k_params, n_inputs, n_hidden, n_outputs)
    ref = policy_forward_ref(obs, params)

    # Exact-arithmetic path (f32 matmul operands) -> tight tolerance.
    prepped_f32 = prepare_policy_params(params, matmul_dtype=jnp.float32)
    out_f32 = jax.block_until_ready(policy_forward(obs, prepped_f32))
    assert out_f32.shape == (B, n_outputs)
    assert jnp.allclose(out_f32, ref, atol=1e-5, rtol=1e-5), "f32 path mismatch"

    # Performance path (bf16 MXU operands, f32 accumulation/bias/tanh).
    prepped_bf16 = prepare_policy_params(params)  # default bf16
    out_bf16 = jax.block_until_ready(policy_forward(obs, prepped_bf16))
    assert out_bf16.shape == (B, n_outputs)
    assert jnp.allclose(out_bf16, ref, atol=2e-2, rtol=2e-2), "bf16 path mismatch"

    # Larger ragged batch: multi-step "parallel" grid + partial final tile.
    B2 = 1000
    obs2 = jax.random.normal(jax.random.PRNGKey(1), (B2, n_inputs), dtype=jnp.float32)
    out2 = jax.block_until_ready(policy_forward(obs2, prepped_f32))
    ref2 = policy_forward_ref(obs2, params)
    assert out2.shape == (B2, n_outputs)
    assert jnp.allclose(out2, ref2, atol=1e-5, rtol=1e-5), "batched mismatch"

    # TODO(synk): Adam optimizer step / device placement from the original module
    # are training plumbing with no forward-pass Pallas equivalent.
    print("KERNEL_OK")
</pallas_src>

<mosaic_0001>
module attributes {stable_mosaic.version = 11 : i64} {
  func.func @_policy_kernel(%arg0: i32, %arg1: memref<8x16xf32, #tpu.memory_space<vmem>>, %arg2: memref<16x32xf32, #tpu.memory_space<vmem>>, %arg3: memref<32x32xf32, #tpu.memory_space<vmem>>, %arg4: memref<32x4xf32, #tpu.memory_space<vmem>>, %arg5: memref<1x32xf32, #tpu.memory_space<vmem>>, %arg6: memref<1x32xf32, #tpu.memory_space<vmem>>, %arg7: memref<1x4xf32, #tpu.memory_space<vmem>>, %arg8: memref<8x4xf32, #tpu.memory_space<vmem>>) attributes {dimension_semantics = [#tpu.dimension_semantics<parallel>], iteration_bounds = array<i64: 1>, scalar_prefetch = 0 : i64, scratch_operands = 0 : i64, tpu.core_type = #tpu.core_type<tc>, window_params = [{transform_indices = @transform_0, window_bounds = array<i64: 8, 16>}, {pipeline_mode = #tpu.pipeline_mode<synchronous>, transform_indices = @transform_1, window_bounds = array<i64: 16, 32>}, {pipeline_mode = #tpu.pipeline_mode<synchronous>, transform_indices = @transform_2, window_bounds = array<i64: 32, 32>}, {pipeline_mode = #tpu.pipeline_mode<synchronous>, transform_indices = @transform_3, window_bounds = array<i64: 32, 4>}, {pipeline_mode = #tpu.pipeline_mode<synchronous>, transform_indices = @transform_4, window_bounds = array<i64: 1, 32>}, {pipeline_mode = #tpu.pipeline_mode<synchronous>, transform_indices = @transform_5, window_bounds = array<i64: 1, 32>}, {pipeline_mode = #tpu.pipeline_mode<synchronous>, transform_indices = @transform_6, window_bounds = array<i64: 1, 4>}, {transform_indices = @transform_7, window_bounds = array<i64: 8, 4>}]} {
    %c0 = arith.constant 0 : index
    %c0_0 = arith.constant 0 : index
    %0 = vector.load %arg1[%c0, %c0_0] : memref<8x16xf32, #tpu.memory_space<vmem>>, vector<8x16xf32>
    %c0_1 = arith.constant 0 : index
    %c0_2 = arith.constant 0 : index
    %1 = vector.load %arg2[%c0_1, %c0_2] : memref<16x32xf32, #tpu.memory_space<vmem>>, vector<16x32xf32>
    %c0_3 = arith.constant 0 : index
    %c0_4 = arith.constant 0 : index
    %2 = vector.load %arg3[%c0_3, %c0_4] : memref<32x32xf32, #tpu.memory_space<vmem>>, vector<32x32xf32>
    %c0_5 = arith.constant 0 : index
    %c0_6 = arith.constant 0 : index
    %3 = vector.load %arg4[%c0_5, %c0_6] : memref<32x4xf32, #tpu.memory_space<vmem>>, vector<32x4xf32>
    %cst = arith.constant dense<0.000000e+00> : vector<8x32xf32>
    %4 = tpu.matmul %0, %1, %cst {dimension_numbers = #tpu.dot_dimension_numbers<[1], [0], [0], [1], [0, 0, 1, 1], [], []>} : vector<8x16xf32>, vector<16x32xf32>, vector<8x32xf32> -> vector<8x32xf32>
    %c0_7 = arith.constant 0 : index
    %c0_8 = arith.constant 0 : index
    %5 = vector.load %arg5[%c0_7, %c0_8] : memref<1x32xf32, #tpu.memory_space<vmem>>, vector<1x32xf32>
    %6 = vector.broadcast %5 : vector<1x32xf32> to vector<8x32xf32>
    %7 = arith.addf %4, %6 : vector<8x32xf32>
    %8 = math.tanh %7 : vector<8x32xf32>
    %cst_9 = arith.constant dense<0.000000e+00> : vector<8x32xf32>
    %9 = tpu.matmul %8, %2, %cst_9 {dimension_numbers = #tpu.dot_dimension_numbers<[1], [0], [0], [1], [0, 0, 1, 1], [], []>} : vector<8x32xf32>, vector<32x32xf32>, vector<8x32xf32> -> vector<8x32xf32>
    %c0_10 = arith.constant 0 : index
    %c0_11 = arith.constant 0 : index
    %10 = vector.load %arg6[%c0_10, %c0_11] : memref<1x32xf32, #tpu.memory_space<vmem>>, vector<1x32xf32>
    %11 = vector.broadcast %10 : vector<1x32xf32> to vector<8x32xf32>
    %12 = arith.addf %9, %11 : vector<8x32xf32>
    %13 = math.tanh %12 : vector<8x32xf32>
    %cst_12 = arith.constant dense<0.000000e+00> : vector<8x4xf32>
    %14 = tpu.matmul %13, %3, %cst_12 {dimension_numbers = #tpu.dot_dimension_numbers<[1], [0], [0], [1], [0, 0, 1, 1], [], []>} : vector<8x32xf32>, vector<32x4xf32>, vector<8x4xf32> -> vector<8x4xf32>
    %c0_13 = arith.constant 0 : index
    %c0_14 = arith.constant 0 : index
    %15 = vector.load %arg7[%c0_13, %c0_14] : memref<1x4xf32, #tpu.memory_space<vmem>>, vector<1x4xf32>
    %16 = vector.broadcast %15 : vector<1x4xf32> to vector<8x4xf32>
    %17 = arith.addf %14, %16 : vector<8x4xf32>
    %c0_15 = arith.constant 0 : index
    %c0_16 = arith.constant 0 : index
    %18 = vector.load %arg8[%c0_15, %c0_16] : memref<8x4xf32, #tpu.memory_space<vmem>>, vector<8x4xf32>
    tpu.vector_store %arg8[%c0_15, %c0_16], %17 {strides = array<i32>} : memref<8x4xf32, #tpu.memory_space<vmem>>, vector<8x4xf32>,
    return
  }
  func.func @transform_0(%arg0: i32) -> (i32, i32) {
    %c0_i32 = arith.constant 0 : i32
    %c0_i32_0 = arith.constant 0 : i32
    return %arg0, %c0_i32 : i32, i32
  }
  func.func @transform_1(%arg0: i32) -> (i32, i32) {
    %c0_i32 = arith.constant 0 : i32
    %c0_i32_0 = arith.constant 0 : i32
    %c0_i32_1 = arith.constant 0 : i32
    return %c0_i32, %c0_i32_0 : i32, i32
  }
  func.func @transform_2(%arg0: i32) -> (i32, i32) {
    %c0_i32 = arith.constant 0 : i32
    %c0_i32_0 = arith.constant 0 : i32
    %c0_i32_1 = arith.constant 0 : i32
    return %c0_i32, %c0_i32_0 : i32, i32
  }
  func.func @transform_3(%arg0: i32) -> (i32, i32) {
    %c0_i32 = arith.constant 0 : i32
    %c0_i32_0 = arith.constant 0 : i32
    %c0_i32_1 = arith.constant 0 : i32
    return %c0_i32, %c0_i32_0 : i32, i32
  }
  func.func @transform_4(%arg0: i32) -> (i32, i32) {
    %c0_i32 = arith.constant 0 : i32
    %c0_i32_0 = arith.constant 0 : i32
    %c0_i32_1 = arith.constant 0 : i32
    return %c0_i32, %c0_i32_0 : i32, i32
  }
  func.func @transform_5(%arg0: i32) -> (i32, i32) {
    %c0_i32 = arith.constant 0 : i32
    %c0_i32_0 = arith.constant 0 : i32
    %c0_i32_1 = arith.constant 0 : i32
    return %c0_i32, %c0_i32_0 : i32, i32
  }
  func.func @transform_6(%arg0: i32) -> (i32, i32) {
    %c0_i32 = arith.constant 0 : i32
    %c0_i32_0 = arith.constant 0 : i32
    %c0_i32_1 = arith.constant 0 : i32
    return %c0_i32, %c0_i32_0 : i32, i32
  }
  func.func @transform_7(%arg0: i32) -> (i32, i32) {
    %c0_i32 = arith.constant 0 : i32
    %c0_i32_0 = arith.constant 0 : i32
    return %arg0, %c0_i32 : i32, i32
  }
}

</mosaic_0001>

<bundles_post_ra>
// kernel: _policy_forward_impl.1
= control target key start
LH: loop header
LB: loop body
LE: loop exit
PB: predicated region body
PF: predicated region fallthrough
CT: control target
= control target key end

     0   :  { %12 = vsyncpa [#allocation3], 0  ;;  %s399_s24 = smov [#allocation2]   ;;  %s498_s0 = inlined_call_operand.vmem [shape: f32[8,16], index: 0, kind: input, shape index: {}]   ;;  %s499_s1 = inlined_call_operand.hbm [shape: f32[16,32], index: 1, kind: input, shape index: {}]   ;;  %s500_s2 = inlined_call_operand.vmem [shape: f32[32,32], index: 2, kind: input, shape index: {}]   ;;  %s501_s3 = inlined_call_operand.vmem [shape: f32[32,4], index: 3, kind: input, shape index: {}]   ;;  %s502_s4 = inlined_call_operand.vmem [shape: f32[1,32], index: 4, kind: input, shape index: {}]   ;;  %s503_s5 = inlined_call_operand.vmem [shape: f32[1,32], index: 5, kind: input, shape index: {}]   ;;  %s504_s6 = inlined_call_operand.vmem [shape: f32[1,4], index: 6, kind: input, shape index: {}]   ;;  %s505_s7 = inlined_call_operand.vmem [shape: f32[8,4], index: 7, kind: output, shape index: {}]  }
   0x1   :  { %s20_s25 = sshll.u32 %s399_s24, 4  ;;  %s375_s28 = scalar_lea.hbm %s499_s1, 256  ;;  %s21_s25 = int_to_ptr.vmem [resolvable:$true] %s20_s25 }
   0x2   :  { %p376_p0 = scmp.ne.s32.totalorder %s499_s1, %s375_s28  ;;  %p379_p1 = scmp.lt.u32.totalorder %s375_s28, %s499_s1 }
   0x4   :  { %p381_p2 = pnand %p379_p1, %p376_p0 }
   0x6   :  { %384 = shalt.err (!%p381_p2)
}
   0x7   :  { %s385_s10 = scalar_lea.vmem %s21_s25, 256  ;;  %p390_p4 = scmp.lt.s32.totalorder %s21_s25, %s21_s25 }
   0x8   :  { %p386_p3 = scmp.ne.s32.totalorder %s21_s25, %s385_s10  ;;  %p391_p5 = scmp.lt.s32.totalorder %s385_s10, %s385_s10 }
   0xa   :  { %p392_p6 = por %p391_p5, %p390_p4 }
   0xc   :  { %p393_p7 = pnand %p392_p6, %p386_p3 }
   0xe   :  { %396 = shalt.err (!%p393_p7)
}
   0xf   :  { %s400_s11 = smov 128   ;;  %s401_s12 = smov 8  }
  0x10   :  { %26 = dma.hbm_to_vmem [thread:$0]  %s499_s1, 256, %s21_s25, [#allocation3], %s400_s11, %s400_s11, %s401_s12  }
  0x11   :  { %397 = dma.done.wait [#allocation3], 256  }
  0x12   :  { %398 = vsyncadd [#allocation3], 4294967040  ;;  %v402_v0 = vmov 0.0|0.0   ;;  %vm403_vm0 = vmmov 0   ;;  %v404_v1 = vmov 0.0   ;;  %v41_v2 = vld [vmem:[#allocation2] sm:$0xff] }
  0x13   :  { %350 = vmatprep.subr.bf16.mxu0 %v402_v0  ;;  %325 = vmatprep.mubr.msk.f32.mxu0 %vm403_vm0, %v404_v1  ;;  %v42_v3 = vld [vmem:[#allocation2 + $0x8] sm:$0xff]  ;;  %v40_v5 = vld [vmem:[%s498_s0] sm:$0xff]  ;;  %vm58_vm1 = vcmask 130048   ;;  %v45_v8 = vld [vmem:[%s500_s2 + $0x10] sm:$0xff]  ;;  %vm140_vm2 = vcmask 261120   ;;  %vm295_vm3 = vcmask 31744  }
  0x14   :  { %353 = vmatprep.subr.bf16.mxu1 %v402_v0  ;;  %336 = vmatprep.mubr.msk.f32.mxu1 %vm403_vm0, %v404_v1  ;;  %v351_v4 = vpack.c.bf16 %v42_v3, %v41_v2  ;;  %v43_v6 = vld [vmem:[%s500_s2] sm:$0xff]  ;;  %v44_v7 = vld [vmem:[%s500_s2 + $0x8] sm:$0xff]  ;;  %v46_v10 = vld [vmem:[%s500_s2 + $0x18] sm:$0xff] }
  0x15   :  { %v354_v9 = vpack.c.bf16 %v44_v7, %v43_v6  ;;  %v357_v11 = vpack.c.bf16 %v46_v10, %v45_v8  ;;  %v302_v12 = vld [vmem:[%s502_s4] ss:$0 sm:$0xff]  ;;  %v48_v18 = vld [vmem:[%s501_s3 + $0x8] sm:$0xff]  ;;  %v49_v19 = vld [vmem:[%s501_s3 + $0x10] sm:$0xff] }
  0x16   :  { %352 = vmatpush3.bf16.msra.mxu0 %v351_v4  ;;  %v47_v17 = vld [vmem:[%s501_s3] sm:$0xff]  ;;  %v50_v21 = vld [vmem:[%s501_s3 + $0x18] sm:$0xff] }
  0x17   :  { %359 = vmatprep.subr.bf16.mxu0 %v402_v0  ;;  %355 = vmatpush3.bf16.msra.mxu1 %v354_v9  ;;  %v360_v20 = vpack.c.bf16 %v48_v18, %v47_v17  ;;  %v363_v22 = vpack.c.bf16 %v50_v21, %v49_v19  ;;  %v304_v23 = vld [vmem:[%s503_s5] ss:$0 sm:$0xff] }
  0x18   :  { %356 = vmatprep.subr.bf16.mxu1 %v402_v0  ;;  %v306_v28 = vld [vmem:[%s504_s6] ss:$0 sm:$0xff] }
  0x19   :  { %326 = vmatmul.mubr.msk.f32.vlgmr.msra.gmra.mrb[0].mxu0 %vm58_vm1, %v40_v5 }
  0x1a   :  { %347 = vmatprep.mubr.msk.f32.mxu0 %vm403_vm0, %v404_v1  ;;  %361 = vmatpush3.bf16.msra.mxu0 %v360_v20 }
  0x1b   :  { %358 = vmatpush3.bf16.msra.mxu1 %v357_v11  ;;  %362 = vmatprep.subr.bf16.mxu0 %v402_v0 }
  0x1e   :  { %364 = vmatpush3.bf16.msra.mxu0 %v363_v22 }
  0xec   :  { %v128_v13 = vpop.f32.mrb[0].mxu0 }
  0xed   :  { %v129_v14 = vadd.f32 %v302_v12, %v128_v13  ;;  %v327_v15 = vpop.f32.mrb[1].mxu0 }
  0xef   :  { %371 = vtanh.f32 %v129_v14 }
  0xf9   :  { %v372_v16 = vpop.eup %371 }
  0xfa   :  { %337 = vmatmul.mubr.msk.f32.vlgmr.msra.gmra.mrb[0].mxu1 %vm140_vm2, %v372_v16 }
 0x1cd   :  { %v210_v24 = vpop.f32.mrb[0].mxu1 }
 0x1ce   :  { %v211_v25 = vadd.f32 %v304_v23, %v210_v24  ;;  %v338_v26 = vpop.f32.mrb[1].mxu1 }
 0x1d0   :  { %373 = vtanh.f32 %v211_v25 }
 0x1da   :  { %v374_v27 = vpop.eup %373 }
 0x1db   :  { %348 = vmatmul.mubr.msk.f32.vlgmr.msra.gmra.mrb[2].mxu0 %vm140_vm2, %v374_v27 }
 0x2ae   :  { %v291_v29 = vpop.f32.mrb[2].mxu0 }
 0x2af   :  { %v292_v30 = vadd.f32 %v306_v28, %v291_v29  ;;  %v349_v31 = vpop.f32.mrb[3].mxu0 }
 0x2b1   :  { %296 = vst.msk [vmem:[%s505_s7] sm:$0xff] %vm295_vm3, %v292_v30 }
 0x2b2   :  { %301 = vsyncpa [#allocation3], 1 }

</bundles_post_ra>
